<compile_context>
chip_gen: v5e
topology: v5e:2x2
jax: 0.10.0
libtpu: 0.0.40
codegen_flags: <defaults>
</compile_context>

<pallas_src>
import math

import jax
import jax.numpy as jnp
from jax.experimental import pallas as pl
from jax.experimental.pallas import tpu as pltpu

PROJ_DIM = 512
LEAKY_SLOPE = 0.01      # nn.LeakyReLU default negative_slope
_MAX_TB = 1024          # max batch rows per grid step (fat tiles amortize ~0.5us/step)
_SPLIT_B = 512          # above this batch, keep >= 2 grid steps (v7x: 2 TensorCores)


def _round_up(x, m):
    return ((x + m - 1) // m) * m


def _choose_tb(B):
    """Batch tile size: one fat tile for small B, else >=2 multiple-of-8 tiles."""
    if B <= _SPLIT_B:
        return B                                   # block dim == array dim is legal
    return min(_MAX_TB, _round_up(-(-B // 2), 8))  # >=2 steps, capped at _MAX_TB


# ----------------------------------------------------------------------------
# Kernel: one batch tile of   LeakyReLU(noise@W1n + emb@W1e + b1) @ W2 + b2
# ----------------------------------------------------------------------------
def _generator_mlp_kernel(noise_ref, emb_ref, w1n_ref, w1e_ref, b1_ref,
                          w2_ref, b2_ref, o_ref):
    # Layer 1: split contraction replaces concat([noise, emb], -1) @ W1, so no
    # (B, noise+structure) activation is ever materialized in HBM.
    h = jnp.dot(noise_ref[...].astype(jnp.bfloat16), w1n_ref[...],
                preferred_element_type=jnp.float32)
    h = h + jnp.dot(emb_ref[...].astype(jnp.bfloat16), w1e_ref[...],
                    preferred_element_type=jnp.float32)
    # f32 epilogue: bias + LeakyReLU (keep off the bf16 VPU path for v5e).
    h = h + b1_ref[...]
    h = jnp.where(h > 0, h, LEAKY_SLOPE * h)
    # Layer 2: (TB, 512) @ (512, img_dim) + (1, img_dim), written straight to
    # the (B, img_dim) output (no padded columns, no post-kernel slice).
    out = jnp.dot(h.astype(jnp.bfloat16), w2_ref[...],
                  preferred_element_type=jnp.float32)
    o_ref[...] = (out + b2_ref[...]).astype(o_ref.dtype)


@jax.jit
def _generator_mlp(noise, emb, w1n, w1e, b1, w2, b2):
    B, noise_dim = noise.shape
    structure_dim = emb.shape[1]
    img_dim = w2.shape[1]
    tb = _choose_tb(B)
    grid = (pl.cdiv(B, tb),)

    flops = 2 * B * PROJ_DIM * (noise_dim + structure_dim + img_dim)
    bytes_accessed = (
        (noise.size + emb.size + B * img_dim) * 4          # f32 activations in/out
        + (w1n.size + w1e.size + w2.size) * 2               # bf16 weights
        + (b1.size + b2.size) * 4)                          # f32 biases

    return pl.pallas_call(
        _generator_mlp_kernel,
        out_shape=jax.ShapeDtypeStruct((B, img_dim), jnp.float32),
        grid_spec=pltpu.PrefetchScalarGridSpec(
            num_scalar_prefetch=0,
            grid=grid,
            in_specs=[
                pl.BlockSpec((tb, noise_dim), lambda i: (i, 0)),            # noise
                pl.BlockSpec((tb, structure_dim), lambda i: (i, 0)),        # emb
                pl.BlockSpec((noise_dim, PROJ_DIM), lambda i: (0, 0)),      # W1n
                pl.BlockSpec((structure_dim, PROJ_DIM), lambda i: (0, 0)),  # W1e
                pl.BlockSpec((1, PROJ_DIM), lambda i: (0, 0)),              # b1
                pl.BlockSpec((PROJ_DIM, img_dim), lambda i: (0, 0)),        # W2
                pl.BlockSpec((1, img_dim), lambda i: (0, 0)),               # b2
            ],
            out_specs=pl.BlockSpec((tb, img_dim), lambda i: (i, 0)),
        ),
        compiler_params=pltpu.CompilerParams(
            dimension_semantics=("parallel",),      # shard batch over v7x's 2 TCs
            vmem_limit_bytes=32 * 1024 * 1024,      # explicit; safe on v5e/v6e/v7x
        ),
        cost_estimate=pl.CostEstimate(flops=flops, transcendentals=0,
                                      bytes_accessed=bytes_accessed),
    )(noise, emb, w1n, w1e, b1, w2, b2)


# ----------------------------------------------------------------------------
# Parameter init (mimics nn.Linear default init), stored kernel-ready:
# split W1, bf16 weights, f32 biases, layer-2 unpadded (full-width out block).
# ----------------------------------------------------------------------------
def _init_linear(key, in_dim, out_dim):
    kw, kb = jax.random.split(key)
    bound = 1.0 / math.sqrt(float(in_dim))
    w = jax.random.uniform(kw, (in_dim, out_dim), jnp.float32, -bound, bound)
    b = jax.random.uniform(kb, (1, out_dim), jnp.float32, -bound, bound)
    return w, b


def init_base_generator(key, noise_dim, structure_dim, img_dim):
    k1, k2 = jax.random.split(key)
    w1, b1 = _init_linear(k1, noise_dim + structure_dim, PROJ_DIM)
    w2, b2 = _init_linear(k2, PROJ_DIM, img_dim)
    return {
        "w1_noise": w1[:noise_dim].astype(jnp.bfloat16),
        "w1_emb": w1[noise_dim:].astype(jnp.bfloat16),
        "b1": b1,                                  # f32
        "w2": w2.astype(jnp.bfloat16),
        "b2": b2,                                  # f32
    }


def init_multi_generator(key, noise_dim, structure_dim, img_dim):
    k_img, k_txt = jax.random.split(key)
    return {
        "img_generator": init_base_generator(k_img, noise_dim, structure_dim, img_dim),
        "text_generator": init_base_generator(k_txt, noise_dim, structure_dim, img_dim),
        "noise_dim": noise_dim,
    }


# ----------------------------------------------------------------------------
# Forward
# ----------------------------------------------------------------------------
def base_generator_forward(params, noise_dim, batch_ent_emb, noise_key):
    B = batch_ent_emb.shape[0]
    # TODO(synk): noise could be drawn in-kernel (pltpu.prng_seed +
    # pltpu.stateful_normal) to skip this extra launch + HBM round trip; kept
    # in the wrapper so the result stays verifiable against a pure-JAX ref.
    noise = jax.random.normal(noise_key, (B, noise_dim), jnp.float32)
    return _generator_mlp(noise, batch_ent_emb.astype(jnp.float32),
                          params["w1_noise"], params["w1_emb"], params["b1"],
                          params["w2"], params["b2"])


def multi_generator_forward(params, batch_ent_emb, modal, noise_key):
    if modal == 1:
        return base_generator_forward(params["img_generator"],
                                      params["noise_dim"],
                                      batch_ent_emb, noise_key)
    elif modal == 2:
        return base_generator_forward(params["text_generator"],
                                      params["noise_dim"],
                                      batch_ent_emb, noise_key)
    else:
        raise NotImplementedError


# ----------------------------------------------------------------------------
# Self-test
# ----------------------------------------------------------------------------
if __name__ == "__main__":
    # Reference: same bf16-weight / f32-accumulation semantics, plain JAX.
    def ref_forward(noise, emb, p):
        h = jnp.dot(noise.astype(jnp.bfloat16), p["w1_noise"],
                    preferred_element_type=jnp.float32)
        h = h + jnp.dot(emb.astype(jnp.bfloat16), p["w1_emb"],
                        preferred_element_type=jnp.float32)
        h = h + p["b1"]
        h = jnp.where(h > 0, h, LEAKY_SLOPE * h)
        return jnp.dot(h.astype(jnp.bfloat16), p["w2"],
                       preferred_element_type=jnp.float32) + p["b2"]

    key = jax.random.PRNGKey(0)
    k_params, k_emb, k_noise1, k_noise2, k_emb_big, k_noise_big = jax.random.split(key, 6)

    noise_dim = 16
    structure_dim = 32
    img_dim = 32
    params = init_multi_generator(k_params, noise_dim, structure_dim, img_dim)

    # --- small case: single-tile grid, both modals share one compilation ----
    batch = 8
    batch_ent_emb = jax.random.normal(k_emb, (batch, structure_dim), jnp.float32)

    out_img = multi_generator_forward(params, batch_ent_emb, modal=1,
                                      noise_key=k_noise1)
    out_txt = multi_generator_forward(params, batch_ent_emb, modal=2,
                                      noise_key=k_noise2)
    jax.block_until_ready(out_img)
    jax.block_until_ready(out_txt)
    assert out_img.shape == (batch, img_dim)
    assert out_txt.shape == (batch, img_dim)

    noise1 = jax.random.normal(k_noise1, (batch, noise_dim), jnp.float32)
    noise2 = jax.random.normal(k_noise2, (batch, noise_dim), jnp.float32)
    ref1 = ref_forward(noise1, batch_ent_emb, params["img_generator"])
    ref2 = ref_forward(noise2, batch_ent_emb, params["text_generator"])
    assert jnp.allclose(out_img, ref1, atol=2e-2, rtol=2e-2), \
        float(jnp.max(jnp.abs(out_img - ref1)))
    assert jnp.allclose(out_txt, ref2, atol=2e-2, rtol=2e-2), \
        float(jnp.max(jnp.abs(out_txt - ref2)))

    # --- larger case: multi-step grid with a partial last block (B % tb != 0)
    batch_big = 1032
    emb_big = jax.random.normal(k_emb_big, (batch_big, structure_dim), jnp.float32)
    out_big = multi_generator_forward(params, emb_big, modal=1,
                                      noise_key=k_noise_big)
    jax.block_until_ready(out_big)
    assert out_big.shape == (batch_big, img_dim)
    noise_big = jax.random.normal(k_noise_big, (batch_big, noise_dim), jnp.float32)
    ref_big = ref_forward(noise_big, emb_big, params["img_generator"])
    assert jnp.allclose(out_big, ref_big, atol=2e-2, rtol=2e-2), \
        float(jnp.max(jnp.abs(out_big - ref_big)))

    print("KERNEL_OK")
</pallas_src>

<mosaic_0001>
module attributes {stable_mosaic.version = 11 : i64} {
  func.func @_generator_mlp_kernel(%arg0: i32, %arg1: memref<8x16xf32, #tpu.memory_space<vmem>>, %arg2: memref<8x32xf32, #tpu.memory_space<vmem>>, %arg3: memref<16x512xbf16, #tpu.memory_space<vmem>>, %arg4: memref<32x512xbf16, #tpu.memory_space<vmem>>, %arg5: memref<1x512xf32, #tpu.memory_space<vmem>>, %arg6: memref<512x32xbf16, #tpu.memory_space<vmem>>, %arg7: memref<1x32xf32, #tpu.memory_space<vmem>>, %arg8: memref<8x32xf32, #tpu.memory_space<vmem>>) attributes {dimension_semantics = [#tpu.dimension_semantics<parallel>], iteration_bounds = array<i64: 1>, scalar_prefetch = 0 : i64, scratch_operands = 0 : i64, tpu.core_type = #tpu.core_type<tc>, window_params = [{transform_indices = @transform_0, window_bounds = array<i64: 8, 16>}, {transform_indices = @transform_1, window_bounds = array<i64: 8, 32>}, {pipeline_mode = #tpu.pipeline_mode<synchronous>, transform_indices = @transform_2, window_bounds = array<i64: 16, 512>}, {pipeline_mode = #tpu.pipeline_mode<synchronous>, transform_indices = @transform_3, window_bounds = array<i64: 32, 512>}, {pipeline_mode = #tpu.pipeline_mode<synchronous>, transform_indices = @transform_4, window_bounds = array<i64: 1, 512>}, {pipeline_mode = #tpu.pipeline_mode<synchronous>, transform_indices = @transform_5, window_bounds = array<i64: 512, 32>}, {pipeline_mode = #tpu.pipeline_mode<synchronous>, transform_indices = @transform_6, window_bounds = array<i64: 1, 32>}, {transform_indices = @transform_7, window_bounds = array<i64: 8, 32>}]} {
    %c0 = arith.constant 0 : index
    %c0_0 = arith.constant 0 : index
    %0 = vector.load %arg1[%c0, %c0_0] : memref<8x16xf32, #tpu.memory_space<vmem>>, vector<8x16xf32>
    %1 = arith.truncf %0 : vector<8x16xf32> to vector<8x16xbf16>
    %c0_1 = arith.constant 0 : index
    %c0_2 = arith.constant 0 : index
    %2 = vector.load %arg3[%c0_1, %c0_2] : memref<16x512xbf16, #tpu.memory_space<vmem>>, vector<16x512xbf16>
    %cst = arith.constant dense<0.000000e+00> : vector<8x512xf32>
    %3 = tpu.matmul %1, %2, %cst {dimension_numbers = #tpu.dot_dimension_numbers<[1], [0], [0], [1], [0, 0, 1, 1], [], []>} : vector<8x16xbf16>, vector<16x512xbf16>, vector<8x512xf32> -> vector<8x512xf32>
    %c0_3 = arith.constant 0 : index
    %c0_4 = arith.constant 0 : index
    %4 = vector.load %arg2[%c0_3, %c0_4] : memref<8x32xf32, #tpu.memory_space<vmem>>, vector<8x32xf32>
    %5 = arith.truncf %4 : vector<8x32xf32> to vector<8x32xbf16>
    %c0_5 = arith.constant 0 : index
    %c0_6 = arith.constant 0 : index
    %6 = vector.load %arg4[%c0_5, %c0_6] : memref<32x512xbf16, #tpu.memory_space<vmem>>, vector<32x512xbf16>
    %cst_7 = arith.constant dense<0.000000e+00> : vector<8x512xf32>
    %7 = tpu.matmul %5, %6, %cst_7 {dimension_numbers = #tpu.dot_dimension_numbers<[1], [0], [0], [1], [0, 0, 1, 1], [], []>} : vector<8x32xbf16>, vector<32x512xbf16>, vector<8x512xf32> -> vector<8x512xf32>
    %8 = arith.addf %3, %7 : vector<8x512xf32>
    %c0_8 = arith.constant 0 : index
    %c0_9 = arith.constant 0 : index
    %9 = vector.load %arg5[%c0_8, %c0_9] : memref<1x512xf32, #tpu.memory_space<vmem>>, vector<1x512xf32>
    %10 = vector.broadcast %9 : vector<1x512xf32> to vector<8x512xf32>
    %11 = arith.addf %8, %10 : vector<8x512xf32>
    %cst_10 = arith.constant 0.000000e+00 : f32
    %12 = vector.broadcast %cst_10 : f32 to vector<8x512xf32>
    %13 = arith.cmpf ogt, %11, %12 : vector<8x512xf32>
    %cst_11 = arith.constant 0.00999999977 : f32
    %14 = vector.broadcast %cst_11 : f32 to vector<8x512xf32>
    %15 = arith.mulf %14, %11 : vector<8x512xf32>
    %16 = arith.select %13, %11, %15 : vector<8x512xi1>, vector<8x512xf32>
    %17 = arith.truncf %16 : vector<8x512xf32> to vector<8x512xbf16>
    %c0_12 = arith.constant 0 : index
    %c0_13 = arith.constant 0 : index
    %18 = vector.load %arg6[%c0_12, %c0_13] : memref<512x32xbf16, #tpu.memory_space<vmem>>, vector<512x32xbf16>
    %cst_14 = arith.constant dense<0.000000e+00> : vector<8x32xf32>
    %19 = tpu.matmul %17, %18, %cst_14 {dimension_numbers = #tpu.dot_dimension_numbers<[1], [0], [0], [1], [0, 0, 1, 1], [], []>} : vector<8x512xbf16>, vector<512x32xbf16>, vector<8x32xf32> -> vector<8x32xf32>
    %c0_15 = arith.constant 0 : index
    %c0_16 = arith.constant 0 : index
    %20 = vector.load %arg7[%c0_15, %c0_16] : memref<1x32xf32, #tpu.memory_space<vmem>>, vector<1x32xf32>
    %21 = vector.broadcast %20 : vector<1x32xf32> to vector<8x32xf32>
    %22 = arith.addf %19, %21 : vector<8x32xf32>
    %c0_17 = arith.constant 0 : index
    %c0_18 = arith.constant 0 : index
    %23 = vector.load %arg8[%c0_17, %c0_18] : memref<8x32xf32, #tpu.memory_space<vmem>>, vector<8x32xf32>
    tpu.vector_store %arg8[%c0_17, %c0_18], %22 {strides = array<i32>} : memref<8x32xf32, #tpu.memory_space<vmem>>, vector<8x32xf32>,
    return
  }
  func.func @transform_0(%arg0: i32) -> (i32, i32) {
    %c0_i32 = arith.constant 0 : i32
    %c0_i32_0 = arith.constant 0 : i32
    return %arg0, %c0_i32 : i32, i32
  }
  func.func @transform_1(%arg0: i32) -> (i32, i32) {
    %c0_i32 = arith.constant 0 : i32
    %c0_i32_0 = arith.constant 0 : i32
    return %arg0, %c0_i32 : i32, i32
  }
  func.func @transform_2(%arg0: i32) -> (i32, i32) {
    %c0_i32 = arith.constant 0 : i32
    %c0_i32_0 = arith.constant 0 : i32
    %c0_i32_1 = arith.constant 0 : i32
    return %c0_i32, %c0_i32_0 : i32, i32
  }
  func.func @transform_3(%arg0: i32) -> (i32, i32) {
    %c0_i32 = arith.constant 0 : i32
    %c0_i32_0 = arith.constant 0 : i32
    %c0_i32_1 = arith.constant 0 : i32
    return %c0_i32, %c0_i32_0 : i32, i32
  }
  func.func @transform_4(%arg0: i32) -> (i32, i32) {
    %c0_i32 = arith.constant 0 : i32
    %c0_i32_0 = arith.constant 0 : i32
    %c0_i32_1 = arith.constant 0 : i32
    return %c0_i32, %c0_i32_0 : i32, i32
  }
  func.func @transform_5(%arg0: i32) -> (i32, i32) {
    %c0_i32 = arith.constant 0 : i32
    %c0_i32_0 = arith.constant 0 : i32
    %c0_i32_1 = arith.constant 0 : i32
    return %c0_i32, %c0_i32_0 : i32, i32
  }
  func.func @transform_6(%arg0: i32) -> (i32, i32) {
    %c0_i32 = arith.constant 0 : i32
    %c0_i32_0 = arith.constant 0 : i32
    %c0_i32_1 = arith.constant 0 : i32
    return %c0_i32, %c0_i32_0 : i32, i32
  }
  func.func @transform_7(%arg0: i32) -> (i32, i32) {
    %c0_i32 = arith.constant 0 : i32
    %c0_i32_0 = arith.constant 0 : i32
    return %arg0, %c0_i32 : i32, i32
  }
}

</mosaic_0001>

<bundles_post_ra>
// kernel: _generator_mlp.1
= control target key start
LH: loop header
LB: loop body
LE: loop exit
PB: predicated region body
PF: predicated region fallthrough
CT: control target
= control target key end

     0   :  { %vm84_vm0 = vcmask 261120   ;;  %s1060_s0 = inlined_call_operand.vmem [shape: f32[8,16], index: 0, kind: input, shape index: {}]   ;;  %s1061_s1 = inlined_call_operand.vmem [shape: f32[8,32], index: 1, kind: input, shape index: {}]   ;;  %s1062_s2 = inlined_call_operand.vmem [shape: bf16[16,512], index: 2, kind: input, shape index: {}]   ;;  %s1063_s3 = inlined_call_operand.vmem [shape: bf16[32,512], index: 3, kind: input, shape index: {}]   ;;  %s1064_s4 = inlined_call_operand.vmem [shape: f32[1,512], index: 4, kind: input, shape index: {}]   ;;  %s1065_s5 = inlined_call_operand.vmem [shape: bf16[512,32], index: 5, kind: input, shape index: {}]   ;;  %s1066_s6 = inlined_call_operand.vmem [shape: f32[1,32], index: 6, kind: input, shape index: {}]   ;;  %s1067_s7 = inlined_call_operand.hbm [shape: f32[8,32], index: 7, kind: output, shape index: {}]  }
   0x1   :  { %v593_v0 = vld [vmem:[%s1063_s3 + $0x20] sm:$0xf]  ;;  %v769_v1 = vld [vmem:[%s1063_s3 + $0x2c] sm:$0xf0]  ;;  %v767_v2 = vld [vmem:[%s1063_s3 + $0x24] sm:$0xf] }
   0x2   :  { %v594_v3 = vor.u32 %v769_v1, %v593_v0  ;;  %v595_v4 = vld [vmem:[%s1063_s3 + $0x30] sm:$0xf0]  ;;  %v601_v5 = vld [vmem:[%s1063_s3 + $0x28] sm:$0xf]  ;;  %v770_v6 = vld [vmem:[%s1063_s3 + $0x34] sm:$0xf0] }
   0x3   :  { %v598_v7 = vor.u32 %v767_v2, %v595_v4  ;;  %v602_v8 = vor.u32 %v770_v6, %v601_v5  ;;  %v768_v9 = vld [vmem:[%s1063_s3 + $0x2c] sm:$0xf]  ;;  %v603_v10 = vld [vmem:[%s1063_s3 + $0x38] sm:$0xf0]  ;;  %v577_v11 = vld [vmem:[%s1063_s3] sm:$0xf] }
   0x4   :  { %94 = vmatpush.bf16.msra.mxu0 %v594_v3  ;;  %v606_v12 = vor.u32 %v768_v9, %v603_v10  ;;  %v765_v13 = vld [vmem:[%s1063_s3 + $0xc] sm:$0xf0]  ;;  %v763_v14 = vld [vmem:[%s1063_s3 + $0x4] sm:$0xf]  ;;  %v579_v15 = vld [vmem:[%s1063_s3 + $0x10] sm:$0xf0] }
   0x5   :  { %107 = vmatpush.bf16.msra.mxu1 %v598_v7  ;;  %120 = vmatpush.bf16.msra.mxu2 %v602_v8  ;;  %v578_v16 = vor.u32 %v765_v13, %v577_v11  ;;  %v582_v17 = vor.u32 %v763_v14, %v579_v15  ;;  %v585_v18 = vld [vmem:[%s1063_s3 + $0x8] sm:$0xf]  ;;  %v766_v19 = vld [vmem:[%s1063_s3 + $0x14] sm:$0xf0]  ;;  %v764_v20 = vld [vmem:[%s1063_s3 + $0xc] sm:$0xf] }
   0x6   :  { %133 = vmatpush.bf16.msra.mxu3 %v606_v12  ;;  %v586_v21 = vor.u32 %v766_v19, %v585_v18  ;;  %v587_v22 = vld [vmem:[%s1063_s3 + $0x18] sm:$0xf0]  ;;  %v34_v23 = vld [vmem:[%s1061_s1] sm:$0xff]  ;;  %v621_v24 = vld [vmem:[%s1062_s2 + $0x8] sm:$0xf] }
   0x7   :  { %v590_v25 = vor.u32 %v764_v20, %v587_v22  ;;  %v35_v26 = vpack.c.bf16 %v34_v23, %v34_v23  ;;  %v762_v27 = vld [vmem:[%s1062_s2 + $0x14] sm:$0xf0]  ;;  %v760_v28 = vld [vmem:[%s1062_s2 + $0xc] sm:$0xf]  ;;  %v623_v29 = vld [vmem:[%s1062_s2 + $0x18] sm:$0xf0] }
   0x8   :  { %95 = vmatpush.bf16.msra.mxu0 %v578_v16  ;;  %v622_v30 = vor.u32 %v762_v27, %v621_v24  ;;  %v626_v31 = vor.u32 %v760_v28, %v623_v29  ;;  %v613_v32 = vld [vmem:[%s1062_s2] sm:$0xf]  ;;  %v761_v33 = vld [vmem:[%s1062_s2 + $0xc] sm:$0xf0]  ;;  %v759_v34 = vld [vmem:[%s1062_s2 + $0x4] sm:$0xf] }
   0x9   :  { %108 = vmatpush.bf16.msra.mxu1 %v582_v17  ;;  %121 = vmatpush.bf16.msra.mxu2 %v586_v21  ;;  %v614_v35 = vor.u32 %v761_v33, %v613_v32  ;;  %v615_v36 = vld [vmem:[%s1062_s2 + $0x10] sm:$0xf0]  ;;  %v778_v38 = vld [vmem:[%s1065_s5 + $0x38] sm:$0xff] }
   0xa   :  { %134 = vmatpush.bf16.msra.mxu3 %v590_v25  ;;  %v618_v37 = vor.u32 %v759_v34, %v615_v36  ;;  %v786_v39 = vld [vmem:[%s1065_s5 + $0x78] sm:$0xff] }
   0xb   :  { %607 = vmatmul.msk.bf16.vlgmr.msra.gmra.mxu0 %vm84_vm0, %v35_v26 }
   0xd   :  { %197 = vmatpush.bf16.msrb.mxu2 %v622_v30 }
   0xe   :  { %210 = vmatpush.bf16.msrb.mxu3 %v626_v31 }
   0xf   :  { %12 = vsyncpa [#allocation3], 0  ;;  %608 = vmatmul.msk.bf16.vlgmr.msra.gmra.mxu1 %vm84_vm0, %v35_v26  ;;  %609 = vmatmul.msk.bf16.vlgmr.msra.gmra.mxu2 %vm84_vm0, %v35_v26  ;;  %v777_v40 = vld [vmem:[%s1065_s5 + $0x30] sm:$0xff]  ;;  %v28_v42 = vld [vmem:[%s1060_s0] sm:$0xff]  ;;  %vm160_vm1 = vcmask 130048   ;;  %s831_s16 = smov [#allocation2]  }
  0x10   :  { %610 = vmatmul.msk.bf16.vlgmr.msra.gmra.mxu3 %vm84_vm0, %v35_v26  ;;  %171 = vmatpush.bf16.msrb.mxu0 %v614_v35  ;;  %v785_v41 = vld [vmem:[%s1065_s5 + $0x70] sm:$0xff]  ;;  %v29_v43 = vpack.c.bf16 %v28_v42, %v28_v42  ;;  %v794_v44 = vld [vmem:[%s1065_s5 + $0xb8] sm:$0xff]  ;;  %v776_v46 = vld [vmem:[%s1065_s5 + $0x28] sm:$0xff]  ;;  %s564_s17 = sshll.u32 %s831_s16, 4  ;;  %s566_s18 = sshll.u32 %s1067_s7, 4  ;;  %s565_s17 = int_to_ptr.vmem [resolvable:$true] %s564_s17  ;;  %s567_s18 = int_to_ptr.hbm [resolvable:$true] %s566_s18 }
  0x11   :  { %184 = vmatpush.bf16.msrb.mxu1 %v618_v37  ;;  %v802_v45 = vld [vmem:[%s1065_s5 + $0xf8] sm:$0xff]  ;;  %v784_v47 = vld [vmem:[%s1065_s5 + $0x68] sm:$0xff]  ;;  %532 = vmatpush.bf16.msra.mxu2 %v794_v44  ;;  %v793_v48 = vld [vmem:[%s1065_s5 + $0xb0] sm:$0xff] }
  0x12   :  { %545 = vmatpush.bf16.msra.mxu3 %v802_v45  ;;  %v801_v49 = vld [vmem:[%s1065_s5 + $0xf0] sm:$0xff]  ;;  %v775_v50 = vld [vmem:[%s1065_s5 + $0x20] sm:$0xff]  ;;  %v792_v52 = vld [vmem:[%s1065_s5 + $0xa8] sm:$0xff] }
  0x13   :  { %v783_v51 = vld [vmem:[%s1065_s5 + $0x60] sm:$0xff]  ;;  %v800_v53 = vld [vmem:[%s1065_s5 + $0xe8] sm:$0xff]  ;;  %v774_v54 = vld [vmem:[%s1065_s5 + $0x18] sm:$0xff] }
  0x14   :  { %506 = vmatpush.bf16.msra.mxu0 %v778_v38  ;;  %v782_v55 = vld [vmem:[%s1065_s5 + $0x58] sm:$0xff]  ;;  %v791_v56 = vld [vmem:[%s1065_s5 + $0xa0] sm:$0xff]  ;;  %v773_v58 = vld [vmem:[%s1065_s5 + $0x10] sm:$0xff] }
  0x15   :  { %519 = vmatpush.bf16.msra.mxu1 %v786_v39  ;;  %533 = vmatpush.bf16.msra.mxu2 %v793_v48  ;;  %v799_v57 = vld [vmem:[%s1065_s5 + $0xe0] sm:$0xff]  ;;  %v781_v59 = vld [vmem:[%s1065_s5 + $0x50] sm:$0xff]  ;;  %v790_v60 = vld [vmem:[%s1065_s5 + $0x98] sm:$0xff] }
  0x16   :  { %546 = vmatpush.bf16.msra.mxu3 %v801_v49  ;;  %v798_v61 = vld [vmem:[%s1065_s5 + $0xd8] sm:$0xff]  ;;  %v772_v62 = vld [vmem:[%s1065_s5 + $0x8] sm:$0xff]  ;;  %v789_v0 = vld [vmem:[%s1065_s5 + $0x90] sm:$0xff] }
  0x17   :  { %v780_v63 = vld [vmem:[%s1065_s5 + $0x48] sm:$0xff]  ;;  %v797_v1 = vld [vmem:[%s1065_s5 + $0xd0] sm:$0xff]  ;;  %v771_v2 = vld [vmem:[%s1065_s5] sm:$0xff] }
  0x18   :  { %507 = vmatpush.bf16.msra.mxu0 %v777_v40  ;;  %v779_v3 = vld [vmem:[%s1065_s5 + $0x40] sm:$0xff]  ;;  %v788_v4 = vld [vmem:[%s1065_s5 + $0x88] sm:$0xff] }
  0x19   :  { %520 = vmatpush.bf16.msra.mxu1 %v785_v41  ;;  %534 = vmatpush.bf16.msra.mxu2 %v792_v52  ;;  %v796_v5 = vld [vmem:[%s1065_s5 + $0xc8] sm:$0xff]  ;;  %v787_v6 = vld [vmem:[%s1065_s5 + $0x80] sm:$0xff] }
  0x1a   :  { %547 = vmatpush.bf16.msra.mxu3 %v800_v53  ;;  %v795_v7 = vld [vmem:[%s1065_s5 + $0xc0] sm:$0xff] }
  0x1b   :  { %627 = vmatmul.msk.bf16.vlgmr.msrb.gmra.mxu0 %vm160_vm1, %v29_v43  ;;  %v216_v14 = vld [vmem:[%s1064_s4] sm:$0xf] }
  0x1c   :  { %508 = vmatpush.bf16.msra.mxu0 %v776_v46  ;;  %v218_v16 = vperm.slane %v216_v14, 0  ;;  %v219_v19 = vperm.slane %v216_v14, 1  ;;  %v220_v27 = vperm.slane %v216_v14, 2  ;;  %v221_v30 = vperm.slane %v216_v14, 3 }
  0x1d   :  { %521 = vmatpush.bf16.msra.mxu1 %v784_v47  ;;  %535 = vmatpush.bf16.msra.mxu2 %v791_v56 }
  0x1e   :  { %548 = vmatpush.bf16.msra.mxu3 %v799_v57 }
  0x1f   :  { %628 = vmatmul.msk.bf16.vlgmr.msrb.gmra.mxu1 %vm160_vm1, %v29_v43  ;;  %629 = vmatmul.msk.bf16.vlgmr.msrb.gmra.mxu2 %vm160_vm1, %v29_v43 }
  0x20   :  { %630 = vmatmul.msk.bf16.vlgmr.msrb.gmra.mxu3 %vm160_vm1, %v29_v43  ;;  %509 = vmatpush.bf16.msra.mxu0 %v775_v50 }
  0x21   :  { %522 = vmatpush.bf16.msra.mxu1 %v783_v51  ;;  %536 = vmatpush.bf16.msra.mxu2 %v790_v60  ;;  %v804_v51 = vld [vmem:[%s1066_s6] ss:$0 sm:$0xff] }
  0x22   :  { %549 = vmatpush.bf16.msra.mxu3 %v798_v61 }
  0x24   :  { %510 = vmatpush.bf16.msra.mxu0 %v774_v54 }
  0x25   :  { %523 = vmatpush.bf16.msra.mxu1 %v782_v55  ;;  %537 = vmatpush.bf16.msra.mxu2 %v789_v0 }
  0x26   :  { %550 = vmatpush.bf16.msra.mxu3 %v797_v1 }
  0x28   :  { %511 = vmatpush.bf16.msra.mxu0 %v773_v58 }
  0x29   :  { %524 = vmatpush.bf16.msra.mxu1 %v781_v59  ;;  %538 = vmatpush.bf16.msra.mxu2 %v788_v4 }
  0x2a   :  { %551 = vmatpush.bf16.msra.mxu3 %v796_v5 }
  0x2c   :  { %512 = vmatpush.bf16.msra.mxu0 %v772_v62 }
  0x2d   :  { %525 = vmatpush.bf16.msra.mxu1 %v780_v63  ;;  %539 = vmatpush.bf16.msra.mxu2 %v787_v6 }
  0x2e   :  { %552 = vmatpush.bf16.msra.mxu3 %v795_v7 }
  0x30   :  { %513 = vmatpush.bf16.msra.mxu0 %v771_v2 }
  0x31   :  { %526 = vmatpush.bf16.msra.mxu1 %v779_v3 }
  0x88   :  { %v97_v8 = vpop.f32.mrf.mxu0 }
  0x8c   :  { %v110_v9 = vpop.f32.mrf.mxu1 }
  0x90   :  { %v99_v12 = vpop.f32.mrf.mxu0 }
  0x92   :  { %v123_v10 = vpop.f32.mrf.mxu2 }
  0x93   :  { %v136_v11 = vpop.f32.mrf.mxu3 }
  0x94   :  { %v112_v13 = vpop.f32.mrf.mxu1 }
  0x98   :  { %v173_v18 = vpop.f32.mrf.mxu0 }
  0x99   :  { %v174_v20 = vadd.f32 %v173_v18, %v97_v8 }
  0x9a   :  { %v125_v15 = vpop.f32.mrf.mxu2 }
  0x9b   :  { %v138_v17 = vpop.f32.mrf.mxu3  ;;  %v226_v23 = vadd.f32 %v218_v16, %v174_v20 }
  0x9c   :  { %v186_v21 = vpop.f32.mrf.mxu1 }
  0x9d   :  { %v187_v22 = vadd.f32 %v186_v21, %v110_v9  ;;  %vm230_vm2 = vcmp.gt.f32.partialorder %v226_v23, 0.0  ;;  %v234_v25 = vmul.f32 0.01, %v226_v23 }
  0x9f   :  { %v227_v24 = vadd.f32 %v219_v19, %v187_v22  ;;  %v238_v28 = vsel %vm230_vm2, %v226_v23, %v234_v25 }
  0xa0   :  { %v242_v31 = vpack.c.bf16 %v238_v28, %v238_v28  ;;  %v175_v35 = vpop.f32.mrf.mxu0 }
  0xa1   :  { %vm231_vm3 = vcmp.gt.f32.partialorder %v227_v24, 0.0  ;;  %v235_v26 = vmul.f32 0.01, %v227_v24 }
  0xa2   :  { %v199_v29 = vpop.f32.mrf.mxu2  ;;  %514 = vmatmul.bf16.vlgmr.msra.gmra.mxu0 %v242_v31 }
  0xa3   :  { %v239_v32 = vsel %vm231_vm3, %v227_v24, %v235_v26  ;;  %v200_v33 = vadd.f32 %v199_v29, %v123_v10  ;;  %v212_v34 = vpop.f32.mrf.mxu3 }
  0xa4   :  { %v243_v36 = vpack.c.bf16 %v239_v32, %v239_v32  ;;  %v213_v37 = vadd.f32 %v212_v34, %v136_v11  ;;  %v188_v38 = vpop.f32.mrf.mxu1 }
  0xa5   :  { %v228_v39 = vadd.f32 %v220_v27, %v200_v33 }
  0xa6   :  { %v229_v40 = vadd.f32 %v221_v30, %v213_v37  ;;  %527 = vmatmul.bf16.vlgmr.msra.gmra.mxu1 %v243_v36 }
  0xa7   :  { %vm232_vm4 = vcmp.gt.f32.partialorder %v228_v39, 0.0  ;;  %v236_v41 = vmul.f32 0.01, %v228_v39 }
  0xa8   :  { %vm233_vm5 = vcmp.gt.f32.partialorder %v229_v40, 0.0  ;;  %v237_v42 = vmul.f32 0.01, %v229_v40 }
  0xa9   :  { %v240_v43 = vsel %vm232_vm4, %v228_v39, %v236_v41 }
  0xaa   :  { %v244_v44 = vpack.c.bf16 %v240_v43, %v240_v43  ;;  %v241_v45 = vsel %vm233_vm5, %v229_v40, %v237_v42  ;;  %v201_v46 = vpop.f32.mrf.mxu2 }
  0xab   :  { %v245_v47 = vpack.c.bf16 %v241_v45, %v241_v45  ;;  %v214_v48 = vpop.f32.mrf.mxu3 }
  0xac   :  { %540 = vmatmul.bf16.vlgmr.msra.gmra.mxu2 %v244_v44 }
  0xad   :  { %553 = vmatmul.bf16.vlgmr.msra.gmra.mxu3 %v245_v47 }
 0x11f   :  { %v515_v49 = vpop.f32.mrf.mxu0 }
 0x120   :  { %v516_v52 = vadd.f32 %v804_v51, %v515_v49 }
 0x123   :  { %v528_v50 = vpop.f32.mrf.mxu1 }
 0x124   :  { %v529_v55 = vadd.f32 %v528_v50, %v516_v52 }
 0x127   :  { %v517_v53 = vpop.f32.mrf.mxu0 }
 0x12b   :  { %v530_v54 = vpop.f32.mrf.mxu1 }
 0x12f   :  { %v541_v56 = vpop.f32.mrf.mxu2 }
 0x130   :  { %v542_v57 = vadd.f32 %v541_v56, %v529_v55  ;;  %v554_v58 = vpop.f32.mrf.mxu3 }
 0x132   :  { %v555_v59 = vadd.f32 %v554_v58, %v542_v57 }
 0x134   :  { %558 = vst.msk [vmem:[#allocation2] sm:$0xff] %vm84_vm0, %v555_v59 }
 0x135   :  { %569 = dma.vmem_to_hbm [thread:$0]  %s565_s17, 128, %s567_s18, [#allocation3]  }
 0x137   :  { %v543_v60 = vpop.f32.mrf.mxu2 }
 0x138   :  { %v556_v61 = vpop.f32.mrf.mxu3 }
 0x139   :  { %829 = dma.done.wait [#allocation3], 128  }
 0x13a   :  { %830 = vsyncadd [#allocation3], 4294967168 }
 0x13b   :  { %574 = vsyncpa [#allocation3], 1 }

</bundles_post_ra>
